<compile_context>
chip_gen: v5e
topology: v5e:2x2
jax: 0.10.0
libtpu: 0.0.40
codegen_flags: <defaults>
</compile_context>

<pallas_src>
import jax
import jax.numpy as jnp
from jax.experimental import pallas as pl
from jax.experimental.pallas import tpu as pltpu

# Müller–Brown parameters — fixed constants (no learnable weights), baked in
# as compile-time Python constants.
A_ = (-200.0, -100.0, -170.0, 15.0)
a_ = (-1.0, -1.0, -6.5, 0.7)
b_ = (0.0, 0.0, 11.0, 0.6)
c_ = (-10.0, -10.0, -6.5, 0.7)
X_ = (1.0, 0.0, -0.5, -1.0)
Y_ = (0.0, 0.5, 1.5, 1.0)

_SUB, _LANE = 8, 128          # one f32 vreg tile
_BLOCK_ROWS = 512             # rows (of 128 lanes) per grid step; 512*128 elems
_SMALL_N = 4096               # below this, pure-JAX is faster than a kernel launch


def bm_kernel(xy_ref, v_ref):
    """Elementwise hot path: strength-reduced 4-term Gaussian mixture energy."""
    x = xy_ref[0]
    y = xy_ref[1]

    dx0 = x - 1.0
    dy0 = y
    dx1 = x
    dy1 = y - 0.5
    dx2 = x + 0.5
    dy2 = y - 1.5
    dx3 = x + 1.0
    dy3 = y - 1.0

    # Terms 0, 1: b == 0 -> no cross term.
    t0 = -200.0 * jnp.exp(-1.0 * (dx0 * dx0) - 10.0 * (dy0 * dy0))
    t1 = -100.0 * jnp.exp(-1.0 * (dx1 * dx1) - 10.0 * (dy1 * dy1))
    # Terms 2, 3: a == c -> factor the radial part.
    t2 = -170.0 * jnp.exp(-6.5 * (dx2 * dx2 + dy2 * dy2) + 11.0 * (dx2 * dy2))
    t3 = 15.0 * jnp.exp(0.7 * (dx3 * dx3 + dy3 * dy3) + 0.6 * (dx3 * dy3))

    v_ref[...] = (t0 + t1) + (t2 + t3)


def _reference_energy(r):
    """Pure-JAX reference mirroring the PyTorch getEnergy loop."""
    r = jnp.asarray(r, dtype=jnp.float32)
    x, y = r[:, 0], r[:, 1]
    v = jnp.zeros_like(x)
    for i in range(4):
        v = v + A_[i] * jnp.exp(
            a_[i] * (x - X_[i]) ** 2
            + b_[i] * (x - X_[i]) * (y - Y_[i])
            + c_[i] * (y - Y_[i]) ** 2
        )
    return v


def _pallas_energy(r):
    """r: [N, 2] float32 -> V: [N] float32 via the Pallas streaming kernel."""
    r = jnp.asarray(r, dtype=jnp.float32)
    n = r.shape[0]

    # Round rows up to a vreg-sublane multiple, then to a block multiple.
    rows = -(-n // _LANE)                       # ceil(n / 128)
    rows = -(-rows // _SUB) * _SUB              # multiple of 8
    block_rows = min(_BLOCK_ROWS, rows)         # multiple of 8 by construction
    rows_pad = -(-rows // block_rows) * block_rows
    n_pad = rows_pad * _LANE
    grid = rows_pad // block_rows

    # Single packed slab (2, rows_pad, 128): one transpose + pad, no scatters.
    # Zero padding is safe: the potential at (0, 0) is finite and padded lanes
    # are sliced off before returning.
    xy = jnp.pad(r.T, ((0, 0), (0, n_pad - n))).reshape(2, rows_pad, _LANE)

    v = pl.pallas_call(
        bm_kernel,
        out_shape=jax.ShapeDtypeStruct((rows_pad, _LANE), jnp.float32),
        grid_spec=pltpu.PrefetchScalarGridSpec(
            num_scalar_prefetch=0,
            grid=(grid,),
            in_specs=[
                pl.BlockSpec((2, block_rows, _LANE), lambda i: (0, i, 0)),
            ],
            out_specs=pl.BlockSpec((block_rows, _LANE), lambda i: (i, 0)),
        ),
        compiler_params=pltpu.CompilerParams(
            dimension_semantics=("parallel",),
        ),
    )(xy)
    return v.reshape(-1)[:n]


def muller_brown_energy(r, *, min_pallas_points=_SMALL_N):
    """Matches BM.forward: r [N, 2] -> V [N].

    Uses the Pallas kernel for large N and a fused pure-JAX expression for
    small N (kernel launch overhead dominates there).
    """
    r = jnp.asarray(r, dtype=jnp.float32)
    if r.shape[0] < min_pallas_points:
        return _reference_energy(r)
    return _pallas_energy(r)


if __name__ == "__main__":
    key = jax.random.PRNGKey(0)
    k1, k2, k3, k4 = jax.random.split(key, 4)

    # Small case (N=60, matching the original script's linspace size) — uses
    # the small-N fast path.
    n_small = 60
    xs = jax.random.uniform(k1, (n_small,), minval=-1.5, maxval=1.1)
    ys = jax.random.uniform(k2, (n_small,), minval=-0.5, maxval=2.0)
    r_small = jnp.stack([xs, ys], axis=1).astype(jnp.float32)

    v_small = muller_brown_energy(r_small)
    jax.block_until_ready(v_small)
    assert v_small.shape == (n_small,)
    assert jnp.allclose(v_small, _reference_energy(r_small), rtol=1e-4, atol=1e-3)

    # Larger case — forces the Pallas streaming kernel (still a small test).
    n_big = 8192
    xs = jax.random.uniform(k3, (n_big,), minval=-1.5, maxval=1.1)
    ys = jax.random.uniform(k4, (n_big,), minval=-0.5, maxval=2.0)
    r_big = jnp.stack([xs, ys], axis=1).astype(jnp.float32)

    v_big = muller_brown_energy(r_big, min_pallas_points=0)  # force Pallas path
    jax.block_until_ready(v_big)
    assert v_big.shape == (n_big,)
    assert jnp.allclose(v_big, _reference_energy(r_big), rtol=1e-4, atol=1e-3), (
        "mismatch vs reference"
    )

    print("KERNEL_OK")
</pallas_src>

<mosaic_0001>
module attributes {stable_mosaic.version = 11 : i64} {
  func.func @bm_kernel(%arg0: i32, %arg1: memref<2x64x128xf32, #tpu.memory_space<vmem>>, %arg2: memref<64x128xf32, #tpu.memory_space<vmem>>) attributes {dimension_semantics = [#tpu.dimension_semantics<parallel>], iteration_bounds = array<i64: 1>, scalar_prefetch = 0 : i64, scratch_operands = 0 : i64, tpu.core_type = #tpu.core_type<tc>, window_params = [{transform_indices = @transform_0, window_bounds = array<i64: 2, 64, 128>}, {transform_indices = @transform_1, window_bounds = array<i64: 64, 128>}]} {
    %c0 = arith.constant 0 : index
    %c0_0 = arith.constant 0 : index
    %c0_1 = arith.constant 0 : index
    %0 = vector.load %arg1[%c0, %c0_0, %c0_1] : memref<2x64x128xf32, #tpu.memory_space<vmem>>, vector<1x64x128xf32>
    %1 = vector.shape_cast %0 : vector<1x64x128xf32> to vector<64x128xf32>
    %c1 = arith.constant 1 : index
    %c0_2 = arith.constant 0 : index
    %c0_3 = arith.constant 0 : index
    %2 = vector.load %arg1[%c1, %c0_2, %c0_3] : memref<2x64x128xf32, #tpu.memory_space<vmem>>, vector<1x64x128xf32>
    %3 = vector.shape_cast %2 : vector<1x64x128xf32> to vector<64x128xf32>
    %cst = arith.constant 1.000000e+00 : f32
    %4 = vector.broadcast %cst : f32 to vector<64x128xf32>
    %5 = arith.subf %1, %4 : vector<64x128xf32>
    %cst_4 = arith.constant 5.000000e-01 : f32
    %6 = vector.broadcast %cst_4 : f32 to vector<64x128xf32>
    %7 = arith.subf %3, %6 : vector<64x128xf32>
    %cst_5 = arith.constant 5.000000e-01 : f32
    %8 = vector.broadcast %cst_5 : f32 to vector<64x128xf32>
    %9 = arith.addf %1, %8 : vector<64x128xf32>
    %cst_6 = arith.constant 1.500000e+00 : f32
    %10 = vector.broadcast %cst_6 : f32 to vector<64x128xf32>
    %11 = arith.subf %3, %10 : vector<64x128xf32>
    %cst_7 = arith.constant 1.000000e+00 : f32
    %12 = vector.broadcast %cst_7 : f32 to vector<64x128xf32>
    %13 = arith.addf %1, %12 : vector<64x128xf32>
    %cst_8 = arith.constant 1.000000e+00 : f32
    %14 = vector.broadcast %cst_8 : f32 to vector<64x128xf32>
    %15 = arith.subf %3, %14 : vector<64x128xf32>
    %16 = arith.mulf %5, %5 : vector<64x128xf32>
    %cst_9 = arith.constant -1.000000e+00 : f32
    %17 = vector.broadcast %cst_9 : f32 to vector<64x128xf32>
    %18 = arith.mulf %17, %16 : vector<64x128xf32>
    %19 = arith.mulf %3, %3 : vector<64x128xf32>
    %cst_10 = arith.constant 1.000000e+01 : f32
    %20 = vector.broadcast %cst_10 : f32 to vector<64x128xf32>
    %21 = arith.mulf %20, %19 : vector<64x128xf32>
    %22 = arith.subf %18, %21 : vector<64x128xf32>
    %23 = math.exp %22 : vector<64x128xf32>
    %cst_11 = arith.constant -2.000000e+02 : f32
    %24 = vector.broadcast %cst_11 : f32 to vector<64x128xf32>
    %25 = arith.mulf %24, %23 : vector<64x128xf32>
    %26 = arith.mulf %1, %1 : vector<64x128xf32>
    %cst_12 = arith.constant -1.000000e+00 : f32
    %27 = vector.broadcast %cst_12 : f32 to vector<64x128xf32>
    %28 = arith.mulf %27, %26 : vector<64x128xf32>
    %29 = arith.mulf %7, %7 : vector<64x128xf32>
    %cst_13 = arith.constant 1.000000e+01 : f32
    %30 = vector.broadcast %cst_13 : f32 to vector<64x128xf32>
    %31 = arith.mulf %30, %29 : vector<64x128xf32>
    %32 = arith.subf %28, %31 : vector<64x128xf32>
    %33 = math.exp %32 : vector<64x128xf32>
    %cst_14 = arith.constant -1.000000e+02 : f32
    %34 = vector.broadcast %cst_14 : f32 to vector<64x128xf32>
    %35 = arith.mulf %34, %33 : vector<64x128xf32>
    %36 = arith.mulf %9, %9 : vector<64x128xf32>
    %37 = arith.mulf %11, %11 : vector<64x128xf32>
    %38 = arith.addf %36, %37 : vector<64x128xf32>
    %cst_15 = arith.constant -6.500000e+00 : f32
    %39 = vector.broadcast %cst_15 : f32 to vector<64x128xf32>
    %40 = arith.mulf %39, %38 : vector<64x128xf32>
    %41 = arith.mulf %9, %11 : vector<64x128xf32>
    %cst_16 = arith.constant 1.100000e+01 : f32
    %42 = vector.broadcast %cst_16 : f32 to vector<64x128xf32>
    %43 = arith.mulf %42, %41 : vector<64x128xf32>
    %44 = arith.addf %40, %43 : vector<64x128xf32>
    %45 = math.exp %44 : vector<64x128xf32>
    %cst_17 = arith.constant -1.700000e+02 : f32
    %46 = vector.broadcast %cst_17 : f32 to vector<64x128xf32>
    %47 = arith.mulf %46, %45 : vector<64x128xf32>
    %48 = arith.mulf %13, %13 : vector<64x128xf32>
    %49 = arith.mulf %15, %15 : vector<64x128xf32>
    %50 = arith.addf %48, %49 : vector<64x128xf32>
    %cst_18 = arith.constant 0.699999988 : f32
    %51 = vector.broadcast %cst_18 : f32 to vector<64x128xf32>
    %52 = arith.mulf %51, %50 : vector<64x128xf32>
    %53 = arith.mulf %13, %15 : vector<64x128xf32>
    %cst_19 = arith.constant 6.000000e-01 : f32
    %54 = vector.broadcast %cst_19 : f32 to vector<64x128xf32>
    %55 = arith.mulf %54, %53 : vector<64x128xf32>
    %56 = arith.addf %52, %55 : vector<64x128xf32>
    %57 = math.exp %56 : vector<64x128xf32>
    %cst_20 = arith.constant 1.500000e+01 : f32
    %58 = vector.broadcast %cst_20 : f32 to vector<64x128xf32>
    %59 = arith.mulf %58, %57 : vector<64x128xf32>
    %60 = arith.addf %25, %35 : vector<64x128xf32>
    %61 = arith.addf %47, %59 : vector<64x128xf32>
    %62 = arith.addf %60, %61 : vector<64x128xf32>
    %c0_21 = arith.constant 0 : index
    %c0_22 = arith.constant 0 : index
    %63 = vector.load %arg2[%c0_21, %c0_22] : memref<64x128xf32, #tpu.memory_space<vmem>>, vector<64x128xf32>
    tpu.vector_store %arg2[%c0_21, %c0_22], %62 {strides = array<i32>} : memref<64x128xf32, #tpu.memory_space<vmem>>, vector<64x128xf32>,
    return
  }
  func.func @transform_0(%arg0: i32) -> (i32, i32, i32) {
    %c0_i32 = arith.constant 0 : i32
    %c0_i32_0 = arith.constant 0 : i32
    %c0_i32_1 = arith.constant 0 : i32
    return %c0_i32, %arg0, %c0_i32_0 : i32, i32, i32
  }
  func.func @transform_1(%arg0: i32) -> (i32, i32) {
    %c0_i32 = arith.constant 0 : i32
    %c0_i32_0 = arith.constant 0 : i32
    return %arg0, %c0_i32 : i32, i32
  }
}

</mosaic_0001>

<bundles_post_ra>
// kernel: tpu_custom_call.1
= control target key start
LH: loop header
LB: loop body
LE: loop exit
PB: predicated region body
PF: predicated region fallthrough
CT: control target
= control target key end

     0   :  { %6 = vsyncpa [#allocation3], 0  ;;  %s607_s0 = inlined_call_operand.hbm [shape: f32[2,64,128], index: 0, kind: input, shape index: {}]   ;;  %s608_s1 = inlined_call_operand.hbm [shape: f32[64,128], index: 1, kind: output, shape index: {}]  }
   0x1   :  { %7 = vsyncpa [#allocation4], 0  ;;  %s12_s8 = sshll.u32 %s607_s0, 4  ;;  %s581_s9 = smov [#allocation2]   ;;  %s13_s8 = int_to_ptr.hbm [resolvable:$true] %s12_s8 }
   0x2   :  { %s14_s10 = sshll.u32 %s581_s9, 4  ;;  %s582_s11 = smov 128   ;;  %s15_s10 = int_to_ptr.vmem [resolvable:$true] %s14_s10 }
   0x3   :  { %s583_s12 = smov 8  }
   0x4   :  { %20 = dma.hbm_to_vmem [thread:$0]  %s13_s8, 2048, %s15_s10, [#allocation3], %s582_s11, %s582_s11, %s583_s12  }
   0x5   :  { %577 = dma.done.wait [#allocation3], 2048  }
   0x6   :  { %578 = vsyncadd [#allocation3], 4294965248  ;;  %v25_v0 = vld [vmem:[#allocation2] sm:$0xff]  ;;  %v26_v22 = vld [vmem:[#allocation2 + $0x8] sm:$0xff]  ;;  %s584_s0 = smov [#allocation5]   ;;  %s416_s16 = sshll.u32 %s608_s1, 4  ;;  %s417_s16 = int_to_ptr.hbm [resolvable:$true] %s416_s16 }
   0x7   :  { %v34_v1 = vld [vmem:[#allocation2 + $0x40] sm:$0xff]  ;;  %v429_v2 = vadd.f32 -1.0, %v25_v0  ;;  %v58_v4 = vadd.f32 0.5, %v25_v0  ;;  %v74_v6 = vadd.f32 1.0, %v25_v0  ;;  %v154_v9 = vmul.f32 %v25_v0, %v25_v0  ;;  %v35_v23 = vld [vmem:[#allocation2 + $0x48] sm:$0xff]  ;;  %v27_v60 = vld [vmem:[#allocation2 + $0x10] sm:$0xff] }
   0x8   :  { %v437_v3 = vadd.f32 -0.5, %v34_v1  ;;  %v445_v5 = vadd.f32 -1.5, %v34_v1  ;;  %v453_v7 = vadd.f32 -1.0, %v34_v1  ;;  %v106_v8 = vmul.f32 %v34_v1, %v34_v1  ;;  %v36_v0 = vld [vmem:[#allocation2 + $0x50] sm:$0xff]  ;;  %s414_s13 = sshll.u32 %s584_s0, 4  ;;  %s415_s13 = int_to_ptr.vmem [resolvable:$true] %s414_s13 }
   0x9   :  { %v90_v10 = vmul.f32 %v429_v2, %v429_v2  ;;  %v218_v12 = vmul.f32 %v58_v4, %v58_v4  ;;  %v162_v15 = vmul.f32 -1.0, %v154_v9  ;;  %v298_v17 = vmul.f32 %v74_v6, %v74_v6 }
   0xa   :  { %v170_v11 = vmul.f32 %v437_v3, %v437_v3  ;;  %v226_v13 = vmul.f32 %v445_v5, %v445_v5  ;;  %v114_v14 = vmul.f32 10.0, %v106_v8  ;;  %v250_v16 = vmul.f32 %v445_v5, %v58_v4 }
   0xb   :  { %v98_v18 = vmul.f32 -1.0, %v90_v10  ;;  %v306_v21 = vmul.f32 %v453_v7, %v453_v7  ;;  %v330_v25 = vmul.f32 %v453_v7, %v74_v6  ;;  %v430_v26 = vadd.f32 -1.0, %v26_v22 }
   0xc   :  { %v178_v19 = vmul.f32 10.0, %v170_v11  ;;  %v234_v20 = vadd.f32 %v226_v13, %v218_v12  ;;  %v258_v24 = vmul.f32 11.0, %v250_v16  ;;  %v438_v27 = vadd.f32 -0.5, %v35_v23 }
   0xd   :  { %v122_v28 = vsub.f32 %v98_v18, %v114_v14  ;;  %v314_v31 = vadd.f32 %v306_v21, %v298_v17  ;;  %v338_v32 = vmul.f32 0.6, %v330_v25  ;;  %v59_v33 = vadd.f32 0.5, %v26_v22 }
   0xe   :  { %v186_v29 = vsub.f32 %v162_v15, %v178_v19  ;;  %v242_v30 = vmul.f32 -6.5, %v234_v20  ;;  %v446_v34 = vadd.f32 -1.5, %v35_v23  ;;  %v75_v35 = vadd.f32 1.0, %v26_v22 }
   0xf   :  { %v130_v36 = vmul.f32 1.442695, %v122_v28  ;;  %v322_v39 = vmul.f32 0.7, %v314_v31  ;;  %v454_v40 = vadd.f32 -1.0, %v35_v23  ;;  %v91_v41 = vmul.f32 %v430_v26, %v430_v26 }
  0x10   :  { %v194_v37 = vmul.f32 1.442695, %v186_v29  ;;  %v266_v38 = vadd.f32 %v258_v24, %v242_v30  ;;  %v107_v42 = vmul.f32 %v35_v23, %v35_v23  ;;  %v155_v43 = vmul.f32 %v26_v22, %v26_v22 }
  0x11   :  { %465 = vpow2.f32 %v130_v36  ;;  %v346_v45 = vadd.f32 %v338_v32, %v322_v39  ;;  %v171_v46 = vmul.f32 %v438_v27, %v438_v27  ;;  %v99_v47 = vmul.f32 -1.0, %v91_v41 }
  0x12   :  { %v274_v44 = vmul.f32 1.442695, %v266_v38  ;;  %467 = vpow2.f32 %v194_v37  ;;  %v115_v48 = vmul.f32 10.0, %v107_v42  ;;  %v163_v49 = vmul.f32 -1.0, %v155_v43 }
  0x13   :  { %v354_v50 = vmul.f32 1.442695, %v346_v45  ;;  %v179_v51 = vmul.f32 10.0, %v171_v46  ;;  %v219_v52 = vmul.f32 %v59_v33, %v59_v33  ;;  %v227_v54 = vmul.f32 %v446_v34, %v446_v34 }
  0x14   :  { %469 = vpow2.f32 %v274_v44  ;;  %v123_v53 = vsub.f32 %v99_v47, %v115_v48  ;;  %v251_v55 = vmul.f32 %v446_v34, %v59_v33  ;;  %v299_v56 = vmul.f32 %v75_v35, %v75_v35  ;;  %v28_v48 = vld [vmem:[#allocation2 + $0x18] sm:$0xff] }
  0x15   :  { %471 = vpow2.f32 %v354_v50  ;;  %v187_v57 = vsub.f32 %v163_v49, %v179_v51  ;;  %v307_v58 = vmul.f32 %v454_v40, %v454_v40  ;;  %v331_v59 = vmul.f32 %v454_v40, %v75_v35 }
  0x16   :  { %v132_v61 = vmul.f32 1.442695, %v123_v53  ;;  %v235_v62 = vadd.f32 %v227_v54, %v219_v52  ;;  %v259_v63 = vmul.f32 11.0, %v251_v55  ;;  %v431_v1 = vadd.f32 -1.0, %v27_v60  ;;  %v37_v53 = vld [vmem:[#allocation2 + $0x58] sm:$0xff] }
  0x17   :  { %v466_v2 = vpop.eup %465  ;;  %v196_v3 = vmul.f32 1.442695, %v187_v57  ;;  %v315_v4 = vadd.f32 %v307_v58, %v299_v56  ;;  %v339_v5 = vmul.f32 0.6, %v331_v59  ;;  %v439_v6 = vadd.f32 -0.5, %v36_v0 }
  0x18   :  { %v468_v7 = vpop.eup %467  ;;  %v146_v8 = vmul.f32 -200.0, %v466_v2  ;;  %473 = vpow2.f32 %v132_v61  ;;  %v243_v9 = vmul.f32 -6.5, %v235_v62  ;;  %v60_v10 = vadd.f32 0.5, %v27_v60 }
  0x19   :  { %v210_v12 = vmul.f32 -100.0, %v468_v7  ;;  %475 = vpow2.f32 %v196_v3  ;;  %v323_v13 = vmul.f32 0.7, %v315_v4  ;;  %v447_v14 = vadd.f32 -1.5, %v36_v0 }
  0x1a   :  { %v470_v11 = vpop.eup %469  ;;  %v267_v16 = vadd.f32 %v259_v63, %v243_v9  ;;  %v76_v17 = vadd.f32 1.0, %v27_v60  ;;  %v455_v18 = vadd.f32 -1.0, %v36_v0  ;;  %v92_v22 = vmul.f32 %v431_v1, %v431_v1 }
  0x1b   :  { %v290_v15 = vmul.f32 -170.0, %v470_v11  ;;  %v472_v19 = vpop.eup %471  ;;  %v378_v20 = vadd.f32 %v210_v12, %v146_v8  ;;  %v347_v21 = vadd.f32 %v339_v5, %v323_v13  ;;  %v108_v23 = vmul.f32 %v36_v0, %v36_v0 }
  0x1c   :  { %v370_v24 = vmul.f32 15.0, %v472_v19  ;;  %v276_v25 = vmul.f32 1.442695, %v267_v16  ;;  %v156_v26 = vmul.f32 %v27_v60, %v27_v60  ;;  %v172_v27 = vmul.f32 %v439_v6, %v439_v6 }
  0x1d   :  { %v356_v28 = vmul.f32 1.442695, %v347_v21  ;;  %v100_v29 = vmul.f32 -1.0, %v92_v22  ;;  %v116_v30 = vmul.f32 10.0, %v108_v23  ;;  %v220_v31 = vmul.f32 %v60_v10, %v60_v10 }
  0x1e   :  { %v474_v32 = vpop.eup %473  ;;  %v386_v33 = vadd.f32 %v370_v24, %v290_v15  ;;  %477 = vpow2.f32 %v276_v25  ;;  %v164_v34 = vmul.f32 -1.0, %v156_v26  ;;  %v180_v35 = vmul.f32 10.0, %v172_v27 }
  0x1f   :  { %v476_v36 = vpop.eup %475  ;;  %v147_v37 = vmul.f32 -200.0, %v474_v32  ;;  %479 = vpow2.f32 %v356_v28  ;;  %v124_v38 = vsub.f32 %v100_v29, %v116_v30  ;;  %v228_v39 = vmul.f32 %v447_v14, %v447_v14  ;;  %v29_v30 = vld [vmem:[#allocation2 + $0x20] sm:$0xff] }
  0x20   :  { %v394_v40 = vadd.f32 %v386_v33, %v378_v20  ;;  %v211_v41 = vmul.f32 -100.0, %v476_v36  ;;  %v188_v42 = vsub.f32 %v164_v34, %v180_v35  ;;  %v252_v43 = vmul.f32 %v447_v14, %v60_v10 }
  0x21   :  { %v134_v44 = vmul.f32 1.442695, %v124_v38  ;;  %v236_v45 = vadd.f32 %v228_v39, %v220_v31  ;;  %v300_v46 = vmul.f32 %v76_v17, %v76_v17  ;;  %v308_v47 = vmul.f32 %v455_v18, %v455_v18  ;;  %v38_v38 = vld [vmem:[#allocation2 + $0x60] sm:$0xff] }
  0x22   :  { %402 = vst [vmem:[#allocation5] sm:$0xff] %v394_v40  ;;  %v379_v49 = vadd.f32 %v211_v41, %v147_v37  ;;  %v198_v50 = vmul.f32 1.442695, %v188_v42  ;;  %v260_v51 = vmul.f32 11.0, %v252_v43  ;;  %v332_v52 = vmul.f32 %v455_v18, %v76_v17 }
  0x23   :  { %481 = vpow2.f32 %v134_v44  ;;  %v244_v54 = vmul.f32 -6.5, %v236_v45  ;;  %v316_v55 = vadd.f32 %v308_v47, %v300_v46  ;;  %v432_v56 = vadd.f32 -1.0, %v28_v48 }
  0x24   :  { %v478_v57 = vpop.eup %477  ;;  %483 = vpow2.f32 %v198_v50  ;;  %v340_v58 = vmul.f32 0.6, %v332_v52  ;;  %v440_v59 = vadd.f32 -0.5, %v37_v53  ;;  %v61_v60 = vadd.f32 0.5, %v28_v48 }
  0x25   :  { %v480_v61 = vpop.eup %479  ;;  %v291_v62 = vmul.f32 -170.0, %v478_v57  ;;  %v268_v63 = vadd.f32 %v260_v51, %v244_v54  ;;  %v324_v0 = vmul.f32 0.7, %v316_v55  ;;  %v448_v1 = vadd.f32 -1.5, %v37_v53 }
  0x26   :  { %v371_v2 = vmul.f32 15.0, %v480_v61  ;;  %v77_v3 = vadd.f32 1.0, %v28_v48  ;;  %v456_v4 = vadd.f32 -1.0, %v37_v53  ;;  %v93_v5 = vmul.f32 %v432_v56, %v432_v56 }
  0x27   :  { %v278_v6 = vmul.f32 1.442695, %v268_v63  ;;  %v348_v7 = vadd.f32 %v340_v58, %v324_v0  ;;  %v109_v8 = vmul.f32 %v37_v53, %v37_v53  ;;  %v157_v9 = vmul.f32 %v28_v48, %v28_v48 }
  0x28   :  { %v387_v10 = vadd.f32 %v371_v2, %v291_v62  ;;  %v101_v11 = vmul.f32 -1.0, %v93_v5  ;;  %v173_v12 = vmul.f32 %v440_v59, %v440_v59  ;;  %v221_v13 = vmul.f32 %v61_v60, %v61_v60 }
  0x29   :  { %v482_v14 = vpop.eup %481  ;;  %485 = vpow2.f32 %v278_v6  ;;  %v358_v15 = vmul.f32 1.442695, %v348_v7  ;;  %v117_v16 = vmul.f32 10.0, %v109_v8  ;;  %v165_v17 = vmul.f32 -1.0, %v157_v9 }
  0x2a   :  { %v484_v18 = vpop.eup %483  ;;  %v395_v19 = vadd.f32 %v387_v10, %v379_v49  ;;  %v148_v20 = vmul.f32 -200.0, %v482_v14  ;;  %v181_v21 = vmul.f32 10.0, %v173_v12  ;;  %v229_v22 = vmul.f32 %v448_v1, %v448_v1 }
  0x2b   :  { %v212_v23 = vmul.f32 -100.0, %v484_v18  ;;  %487 = vpow2.f32 %v358_v15  ;;  %v125_v24 = vsub.f32 %v101_v11, %v117_v16  ;;  %v253_v25 = vmul.f32 %v448_v1, %v61_v60  ;;  %v30_v16 = vld [vmem:[#allocation2 + $0x28] sm:$0xff] }
  0x2c   :  { %403 = vst [vmem:[#allocation5 + $0x8] sm:$0xff] %v395_v19  ;;  %v189_v26 = vsub.f32 %v165_v17, %v181_v21  ;;  %v237_v27 = vadd.f32 %v229_v22, %v221_v13  ;;  %v301_v28 = vmul.f32 %v77_v3, %v77_v3  ;;  %v309_v29 = vmul.f32 %v456_v4, %v456_v4 }
  0x2d   :  { %v380_v31 = vadd.f32 %v212_v23, %v148_v20  ;;  %v136_v32 = vmul.f32 1.442695, %v125_v24  ;;  %v261_v33 = vmul.f32 11.0, %v253_v25  ;;  %v333_v34 = vmul.f32 %v456_v4, %v77_v3  ;;  %v39_v20 = vld [vmem:[#allocation2 + $0x68] sm:$0xff] }
  0x2e   :  { %v200_v35 = vmul.f32 1.442695, %v189_v26  ;;  %v245_v36 = vmul.f32 -6.5, %v237_v27  ;;  %v317_v37 = vadd.f32 %v309_v29, %v301_v28  ;;  %v433_v39 = vadd.f32 -1.0, %v29_v30 }
  0x2f   :  { %v486_v40 = vpop.eup %485  ;;  %489 = vpow2.f32 %v136_v32  ;;  %v341_v41 = vmul.f32 0.6, %v333_v34  ;;  %v441_v42 = vadd.f32 -0.5, %v38_v38  ;;  %v62_v43 = vadd.f32 0.5, %v29_v30 }
  0x30   :  { %v292_v44 = vmul.f32 -170.0, %v486_v40  ;;  %491 = vpow2.f32 %v200_v35  ;;  %v269_v45 = vadd.f32 %v261_v33, %v245_v36  ;;  %v325_v46 = vmul.f32 0.7, %v317_v37 }
  0x31   :  { %v488_v47 = vpop.eup %487  ;;  %v449_v48 = vadd.f32 -1.5, %v38_v38  ;;  %v78_v49 = vadd.f32 1.0, %v29_v30  ;;  %v457_v50 = vadd.f32 -1.0, %v38_v38  ;;  %v94_v51 = vmul.f32 %v433_v39, %v433_v39 }
  0x32   :  { %v372_v52 = vmul.f32 15.0, %v488_v47  ;;  %v280_v53 = vmul.f32 1.442695, %v269_v45  ;;  %v349_v54 = vadd.f32 %v341_v41, %v325_v46  ;;  %v110_v55 = vmul.f32 %v38_v38, %v38_v38 }
  0x33   :  { %v102_v56 = vmul.f32 -1.0, %v94_v51  ;;  %v158_v57 = vmul.f32 %v29_v30, %v29_v30  ;;  %v174_v58 = vmul.f32 %v441_v42, %v441_v42  ;;  %v222_v59 = vmul.f32 %v62_v43, %v62_v43 }
  0x34   :  { %v388_v60 = vadd.f32 %v372_v52, %v292_v44  ;;  %493 = vpow2.f32 %v280_v53  ;;  %v360_v61 = vmul.f32 1.442695, %v349_v54  ;;  %v118_v62 = vmul.f32 10.0, %v110_v55 }
  0x35   :  { %v490_v63 = vpop.eup %489  ;;  %v166_v0 = vmul.f32 -1.0, %v158_v57  ;;  %v182_v1 = vmul.f32 10.0, %v174_v58  ;;  %v230_v2 = vmul.f32 %v449_v48, %v449_v48  ;;  %v254_v3 = vmul.f32 %v449_v48, %v62_v43 }
  0x36   :  { %v492_v4 = vpop.eup %491  ;;  %v396_v5 = vadd.f32 %v388_v60, %v380_v31  ;;  %v149_v6 = vmul.f32 -200.0, %v490_v63  ;;  %495 = vpow2.f32 %v360_v61  ;;  %v126_v7 = vsub.f32 %v102_v56, %v118_v62 }
  0x37   :  { %v213_v8 = vmul.f32 -100.0, %v492_v4  ;;  %v190_v9 = vsub.f32 %v166_v0, %v182_v1  ;;  %v238_v10 = vadd.f32 %v230_v2, %v222_v59  ;;  %v262_v11 = vmul.f32 11.0, %v254_v3  ;;  %v31_v2 = vld [vmem:[#allocation2 + $0x30] sm:$0xff] }
  0x38   :  { %404 = vst [vmem:[#allocation5 + $0x10] sm:$0xff] %v396_v5  ;;  %v138_v12 = vmul.f32 1.442695, %v126_v7  ;;  %v302_v13 = vmul.f32 %v78_v49, %v78_v49  ;;  %v310_v14 = vmul.f32 %v457_v50, %v457_v50  ;;  %v334_v15 = vmul.f32 %v457_v50, %v78_v49  ;;  %v40_v3 = vld [vmem:[#allocation2 + $0x70] sm:$0xff] }
  0x39   :  { %v381_v17 = vadd.f32 %v213_v8, %v149_v6  ;;  %v202_v18 = vmul.f32 1.442695, %v190_v9  ;;  %v246_v19 = vmul.f32 -6.5, %v238_v10  ;;  %v434_v21 = vadd.f32 -1.0, %v30_v16 }
  0x3a   :  { %v494_v22 = vpop.eup %493  ;;  %497 = vpow2.f32 %v138_v12  ;;  %v318_v23 = vadd.f32 %v310_v14, %v302_v13  ;;  %v342_v24 = vmul.f32 0.6, %v334_v15  ;;  %v442_v25 = vadd.f32 -0.5, %v39_v20 }
  0x3b   :  { %v293_v26 = vmul.f32 -170.0, %v494_v22  ;;  %499 = vpow2.f32 %v202_v18  ;;  %v270_v27 = vadd.f32 %v262_v11, %v246_v19  ;;  %v63_v28 = vadd.f32 0.5, %v30_v16 }
  0x3c   :  { %v496_v29 = vpop.eup %495  ;;  %v326_v30 = vmul.f32 0.7, %v318_v23  ;;  %v450_v31 = vadd.f32 -1.5, %v39_v20  ;;  %v79_v32 = vadd.f32 1.0, %v30_v16  ;;  %v458_v33 = vadd.f32 -1.0, %v39_v20 }
  0x3d   :  { %v373_v34 = vmul.f32 15.0, %v496_v29  ;;  %v282_v35 = vmul.f32 1.442695, %v270_v27  ;;  %v95_v36 = vmul.f32 %v434_v21, %v434_v21  ;;  %v111_v37 = vmul.f32 %v39_v20, %v39_v20 }
  0x3e   :  { %v350_v38 = vadd.f32 %v342_v24, %v326_v30  ;;  %v159_v39 = vmul.f32 %v30_v16, %v30_v16  ;;  %v175_v40 = vmul.f32 %v442_v25, %v442_v25  ;;  %v223_v41 = vmul.f32 %v63_v28, %v63_v28 }
  0x3f   :  { %v389_v42 = vadd.f32 %v373_v34, %v293_v26  ;;  %501 = vpow2.f32 %v282_v35  ;;  %v103_v43 = vmul.f32 -1.0, %v95_v36  ;;  %v119_v44 = vmul.f32 10.0, %v111_v37 }
  0x40   :  { %v498_v45 = vpop.eup %497  ;;  %v362_v46 = vmul.f32 1.442695, %v350_v38  ;;  %v167_v47 = vmul.f32 -1.0, %v159_v39  ;;  %v183_v48 = vmul.f32 10.0, %v175_v40  ;;  %v231_v49 = vmul.f32 %v450_v31, %v450_v31 }
  0x41   :  { %v500_v50 = vpop.eup %499  ;;  %v397_v51 = vadd.f32 %v389_v42, %v381_v17  ;;  %v150_v52 = vmul.f32 -200.0, %v498_v45  ;;  %v127_v53 = vsub.f32 %v103_v43, %v119_v44  ;;  %v255_v54 = vmul.f32 %v450_v31, %v63_v28 }
  0x42   :  { %v214_v55 = vmul.f32 -100.0, %v500_v50  ;;  %503 = vpow2.f32 %v362_v46  ;;  %v191_v56 = vsub.f32 %v167_v47, %v183_v48  ;;  %v239_v57 = vadd.f32 %v231_v49, %v223_v41  ;;  %v32_v48 = vld [vmem:[#allocation2 + $0x38] sm:$0xff] }
  0x43   :  { %405 = vst [vmem:[#allocation5 + $0x18] sm:$0xff] %v397_v51  ;;  %v140_v58 = vmul.f32 1.442695, %v127_v53  ;;  %v263_v59 = vmul.f32 11.0, %v255_v54  ;;  %v303_v60 = vmul.f32 %v79_v32, %v79_v32  ;;  %v311_v61 = vmul.f32 %v458_v33, %v458_v33  ;;  %v41_v49 = vld [vmem:[#allocation2 + $0x78] sm:$0xff] }
  0x44   :  { %v382_v62 = vadd.f32 %v214_v55, %v150_v52  ;;  %v204_v63 = vmul.f32 1.442695, %v191_v56  ;;  %v247_v0 = vmul.f32 -6.5, %v239_v57  ;;  %v335_v1 = vmul.f32 %v458_v33, %v79_v32 }
  0x45   :  { %v502_v4 = vpop.eup %501  ;;  %505 = vpow2.f32 %v140_v58  ;;  %v319_v5 = vadd.f32 %v311_v61, %v303_v60  ;;  %v435_v6 = vadd.f32 -1.0, %v31_v2  ;;  %v443_v7 = vadd.f32 -0.5, %v40_v3 }
  0x46   :  { %v294_v8 = vmul.f32 -170.0, %v502_v4  ;;  %507 = vpow2.f32 %v204_v63  ;;  %v271_v9 = vadd.f32 %v263_v59, %v247_v0  ;;  %v343_v10 = vmul.f32 0.6, %v335_v1 }
  0x47   :  { %v327_v11 = vmul.f32 0.7, %v319_v5  ;;  %v64_v12 = vadd.f32 0.5, %v31_v2  ;;  %v451_v13 = vadd.f32 -1.5, %v40_v3  ;;  %v80_v14 = vadd.f32 1.0, %v31_v2 }
  0x48   :  { %v504_v15 = vpop.eup %503  ;;  %v284_v16 = vmul.f32 1.442695, %v271_v9  ;;  %v459_v17 = vadd.f32 -1.0, %v40_v3  ;;  %v96_v18 = vmul.f32 %v435_v6, %v435_v6  ;;  %v112_v19 = vmul.f32 %v40_v3, %v40_v3 }
  0x49   :  { %v374_v20 = vmul.f32 15.0, %v504_v15  ;;  %v351_v21 = vadd.f32 %v343_v10, %v327_v11  ;;  %v160_v22 = vmul.f32 %v31_v2, %v31_v2  ;;  %v176_v23 = vmul.f32 %v443_v7, %v443_v7 }
  0x4a   :  { %509 = vpow2.f32 %v284_v16  ;;  %v104_v24 = vmul.f32 -1.0, %v96_v18  ;;  %v120_v25 = vmul.f32 10.0, %v112_v19  ;;  %v224_v26 = vmul.f32 %v64_v12, %v64_v12 }
  0x4b   :  { %v506_v27 = vpop.eup %505  ;;  %v390_v28 = vadd.f32 %v374_v20, %v294_v8  ;;  %v364_v29 = vmul.f32 1.442695, %v351_v21  ;;  %v168_v30 = vmul.f32 -1.0, %v160_v22  ;;  %v184_v31 = vmul.f32 10.0, %v176_v23 }
  0x4c   :  { %v508_v32 = vpop.eup %507  ;;  %v151_v33 = vmul.f32 -200.0, %v506_v27  ;;  %v128_v34 = vsub.f32 %v104_v24, %v120_v25  ;;  %v232_v35 = vmul.f32 %v451_v13, %v451_v13  ;;  %v256_v36 = vmul.f32 %v451_v13, %v64_v12 }
  0x4d   :  { %v398_v37 = vadd.f32 %v390_v28, %v382_v62  ;;  %v215_v38 = vmul.f32 -100.0, %v508_v32  ;;  %511 = vpow2.f32 %v364_v29  ;;  %v192_v39 = vsub.f32 %v168_v30, %v184_v31 }
  0x4e   :  { %v142_v40 = vmul.f32 1.442695, %v128_v34  ;;  %v240_v41 = vadd.f32 %v232_v35, %v224_v26  ;;  %v264_v42 = vmul.f32 11.0, %v256_v36  ;;  %v304_v43 = vmul.f32 %v80_v14, %v80_v14 }
  0x4f   :  { %406 = vst [vmem:[#allocation5 + $0x20] sm:$0xff] %v398_v37  ;;  %v383_v44 = vadd.f32 %v215_v38, %v151_v33  ;;  %v206_v45 = vmul.f32 1.442695, %v192_v39  ;;  %v312_v46 = vmul.f32 %v459_v17, %v459_v17  ;;  %v336_v47 = vmul.f32 %v459_v17, %v80_v14 }
  0x50   :  { %v510_v50 = vpop.eup %509  ;;  %513 = vpow2.f32 %v142_v40  ;;  %v248_v51 = vmul.f32 -6.5, %v240_v41  ;;  %v436_v52 = vadd.f32 -1.0, %v32_v48  ;;  %v444_v53 = vadd.f32 -0.5, %v41_v49 }
  0x51   :  { %v295_v54 = vmul.f32 -170.0, %v510_v50  ;;  %515 = vpow2.f32 %v206_v45  ;;  %v320_v55 = vadd.f32 %v312_v46, %v304_v43  ;;  %v344_v56 = vmul.f32 0.6, %v336_v47 }
  0x52   :  { %v272_v57 = vadd.f32 %v264_v42, %v248_v51  ;;  %v65_v58 = vadd.f32 0.5, %v32_v48  ;;  %v452_v59 = vadd.f32 -1.5, %v41_v49  ;;  %v81_v60 = vadd.f32 1.0, %v32_v48 }
  0x53   :  { %v512_v61 = vpop.eup %511  ;;  %v328_v62 = vmul.f32 0.7, %v320_v55  ;;  %v460_v63 = vadd.f32 -1.0, %v41_v49  ;;  %v97_v0 = vmul.f32 %v436_v52, %v436_v52  ;;  %v113_v1 = vmul.f32 %v41_v49, %v41_v49 }
  0x54   :  { %v375_v2 = vmul.f32 15.0, %v512_v61  ;;  %v286_v3 = vmul.f32 1.442695, %v272_v57  ;;  %v161_v4 = vmul.f32 %v32_v48, %v32_v48  ;;  %v177_v5 = vmul.f32 %v444_v53, %v444_v53 }
  0x55   :  { %v352_v6 = vadd.f32 %v344_v56, %v328_v62  ;;  %v105_v7 = vmul.f32 -1.0, %v97_v0  ;;  %v121_v8 = vmul.f32 10.0, %v113_v1  ;;  %v225_v9 = vmul.f32 %v65_v58, %v65_v58 }
  0x56   :  { %v514_v10 = vpop.eup %513  ;;  %v391_v11 = vadd.f32 %v375_v2, %v295_v54  ;;  %517 = vpow2.f32 %v286_v3  ;;  %v169_v12 = vmul.f32 -1.0, %v161_v4  ;;  %v185_v13 = vmul.f32 10.0, %v177_v5 }
  0x57   :  { %v516_v14 = vpop.eup %515  ;;  %v366_v15 = vmul.f32 1.442695, %v352_v6  ;;  %v129_v16 = vsub.f32 %v105_v7, %v121_v8  ;;  %v233_v17 = vmul.f32 %v452_v59, %v452_v59  ;;  %v257_v20 = vmul.f32 %v452_v59, %v65_v58 }
  0x58   :  { %v399_v18 = vadd.f32 %v391_v11, %v383_v44  ;;  %v193_v19 = vsub.f32 %v169_v12, %v185_v13  ;;  %v305_v23 = vmul.f32 %v81_v60, %v81_v60  ;;  %v313_v26 = vmul.f32 %v460_v63, %v460_v63 }
  0x59   :  { %519 = vpow2.f32 %v366_v15  ;;  %v144_v21 = vmul.f32 1.442695, %v129_v16  ;;  %v241_v22 = vadd.f32 %v233_v17, %v225_v9  ;;  %v265_v25 = vmul.f32 11.0, %v257_v20 }
  0x5a   :  { %407 = vst [vmem:[#allocation5 + $0x28] sm:$0xff] %v399_v18  ;;  %v208_v24 = vmul.f32 1.442695, %v193_v19  ;;  %v337_v28 = vmul.f32 %v460_v63, %v81_v60  ;;  %v152_v30 = vmul.f32 -200.0, %v514_v10  ;;  %v216_v31 = vmul.f32 -100.0, %v516_v14 }
  0x5b   :  { %v249_v27 = vmul.f32 -6.5, %v241_v22  ;;  %v321_v32 = vadd.f32 %v313_v26, %v305_v23  ;;  %521 = vpow2.f32 %v144_v21 }
  0x5c   :  { %v518_v29 = vpop.eup %517  ;;  %v345_v34 = vmul.f32 0.6, %v337_v28  ;;  %523 = vpow2.f32 %v208_v24  ;;  %v384_v40 = vadd.f32 %v216_v31, %v152_v30 }
  0x5d   :  { %v273_v33 = vadd.f32 %v265_v25, %v249_v27  ;;  %v296_v35 = vmul.f32 -170.0, %v518_v29  ;;  %v329_v36 = vmul.f32 0.7, %v321_v32 }
  0x5f   :  { %v520_v37 = vpop.eup %519  ;;  %v288_v38 = vmul.f32 1.442695, %v273_v33  ;;  %v353_v41 = vadd.f32 %v345_v34, %v329_v36 }
  0x60   :  { %v376_v39 = vmul.f32 15.0, %v520_v37 }
  0x61   :  { %525 = vpow2.f32 %v288_v38  ;;  %v368_v43 = vmul.f32 1.442695, %v353_v41  ;;  %v522_v44 = vpop.eup %521 }
  0x62   :  { %v392_v42 = vadd.f32 %v376_v39, %v296_v35  ;;  %v524_v45 = vpop.eup %523  ;;  %v153_v48 = vmul.f32 -200.0, %v522_v44 }
  0x63   :  { %527 = vpow2.f32 %v368_v43  ;;  %v217_v49 = vmul.f32 -100.0, %v524_v45 }
  0x64   :  { %v400_v46 = vadd.f32 %v392_v42, %v384_v40 }
  0x65   :  { %v385_v53 = vadd.f32 %v217_v49, %v153_v48 }
  0x66   :  { %408 = vst [vmem:[#allocation5 + $0x30] sm:$0xff] %v400_v46 }
  0x67   :  { %v526_v47 = vpop.eup %525 }
  0x68   :  { %v297_v50 = vmul.f32 -170.0, %v526_v47 }
  0x69   :  { %v528_v51 = vpop.eup %527 }
  0x6a   :  { %v377_v52 = vmul.f32 15.0, %v528_v51 }
  0x6c   :  { %v393_v54 = vadd.f32 %v377_v52, %v297_v50 }
  0x6e   :  { %v401_v55 = vadd.f32 %v393_v54, %v385_v53 }
  0x70   :  { %409 = vst [vmem:[#allocation5 + $0x38] sm:$0xff] %v401_v55 }
  0x71   :  { %422 = dma.vmem_to_hbm [thread:$0]  %s415_s13, 1024, %s417_s16, [#allocation4], %s582_s11, %s582_s11, %s583_s12  }
  0x72   :  { %579 = dma.done.wait [#allocation4], 1024  }
  0x73   :  { %580 = vsyncadd [#allocation4], 4294966272 }
  0x74   :  { %427 = vsyncpa [#allocation3], 1 }
  0x75   :  { %428 = vsyncpa [#allocation4], 1 }

</bundles_post_ra>
